<compile_context>
chip_gen: v6e
topology: v6e:2x2x1
jax: 0.10.0
libtpu: 0.0.40
codegen_flags: <defaults>
</compile_context>

<pallas_src>
import functools

import jax
import jax.numpy as jnp
from jax.experimental import pallas as pl
from jax.experimental.pallas import tpu as pltpu

_TILE_B_MAX = 4096        # ~10-12 MiB/step VMEM at hidden<=128; fits all generations w/ limit below
_MEGACORE_MIN_B = 64      # below this, splitting the grid for a 2nd TensorCore is pure overhead
_VMEM_LIMIT_BYTES = 32 << 20


def _round_up(x, m):
    return (x + m - 1) // m * m


def _cdiv(a, b):
    return (a + b - 1) // b


def _choose_tiling(batch):
    """Pick (tile_b, b_pad): equal 8-aligned tiles, minimal padding, >=2 grid steps for
    batches large enough that megacore sharding pays off."""
    b8 = _round_up(max(batch, 8), 8)
    n_tiles = _cdiv(b8, _TILE_B_MAX)
    if b8 >= _MEGACORE_MIN_B:
        n_tiles = max(n_tiles, 2)          # let ("parallel",) use both TCs on v7x
    tile_b = _round_up(_cdiv(b8, n_tiles), 8)
    b_pad = _round_up(b8, tile_b)
    return tile_b, b_pad


def _qnet_kernel(x_ref, w_ref, b_ref, out_ref, *, in_dim, n_output):
    # x tile: [TILE_B, in_dim] bf16 (cast in wrapper); MXU matmuls accumulate in f32.
    xb = x_ref[...]

    # Layer 1: only the first `in_dim` rows of packed W[0] hold real weights (static ref view).
    # Padded output lanes see zero weights + zero bias -> 0 after ReLU, so they stay inert.
    h = jnp.dot(xb, w_ref[0, :in_dim, :], preferred_element_type=jnp.float32) + b_ref[0:1, :]
    h = jnp.maximum(h, 0.0)  # elementwise kept in f32 (portable to v5e, no bf16 VPU there)

    # Layer 2.
    h = jnp.dot(h.astype(jnp.bfloat16), w_ref[1], preferred_element_type=jnp.float32) + b_ref[1:2, :]
    h = jnp.maximum(h, 0.0)

    # Layer 3: compute over the full 128-lane tile, then store only the real n_output columns.
    # out_ref is [TILE_B, n_output] (full-extent last dim): masked vst, but ~32x fewer HBM bytes
    # than the old 128-lane f32 output slab.
    h = jnp.dot(h.astype(jnp.bfloat16), w_ref[2], preferred_element_type=jnp.float32) + b_ref[2:3, :]
    out_ref[...] = h[:, :n_output]


def q_net_forward(state, packed):
    """state: [B, state_dim]. packed: output of pack_qnet_params."""
    W, bias = packed["W"], packed["b"]
    in_dim, n_output, pad = packed["in_dim"], packed["n_output"], packed["pad"]

    # Cast once in the wrapper: halves the lane-sparse input DMA and removes the in-kernel cast.
    state = state.astype(jnp.bfloat16)
    B = state.shape[0]

    tile_b, b_pad = _choose_tiling(B)
    if b_pad != B:
        state = jnp.pad(state, ((0, b_pad - B), (0, 0)))

    grid = (b_pad // tile_b,)

    out = pl.pallas_call(
        functools.partial(_qnet_kernel, in_dim=in_dim, n_output=n_output),
        out_shape=jax.ShapeDtypeStruct((b_pad, n_output), jnp.float32),
        grid_spec=pltpu.PrefetchScalarGridSpec(
            num_scalar_prefetch=0,
            grid=grid,
            in_specs=[
                # Streamed per grid step (double-buffered by the BlockSpec pipeline).
                pl.BlockSpec((tile_b, in_dim), lambda i: (i, 0)),
                # Constant index_map -> fetched once, VMEM-resident across all batch tiles.
                pl.BlockSpec((3, pad, pad), lambda i: (0, 0, 0)),
                pl.BlockSpec((3, pad), lambda i: (0, 0)),
            ],
            out_specs=pl.BlockSpec((tile_b, n_output), lambda i: (i, 0)),
        ),
        compiler_params=pltpu.CompilerParams(
            dimension_semantics=("parallel",),      # megacore batch sharding on v7x
            vmem_limit_bytes=_VMEM_LIMIT_BYTES,     # keep tile_b=4096 legal on v5e's 16 MiB default
        ),
    )(state, W, bias)

    # Drop batch padding; output already has exactly n_output columns.
    return out[:B, :]


def init_qnet_params(key, n_input, n_output, hidden_size=64):
    """Deterministic synthetic init (Kaiming-uniform-ish, like torch.nn.Linear).
    Weights stored [in_features, out_features] so the kernel computes x @ W + b directly."""
    k1, k2, k3, k4, k5, k6 = jax.random.split(key, 6)

    def lin_init(kw, kb, fan_in, fan_out):
        bound = 1.0 / jnp.sqrt(fan_in)
        w = jax.random.uniform(kw, (fan_in, fan_out), jnp.float32, -bound, bound)
        b = jax.random.uniform(kb, (1, fan_out), jnp.float32, -bound, bound)
        return w, b

    w1, b1 = lin_init(k1, k2, n_input, hidden_size)
    w2, b2 = lin_init(k3, k4, hidden_size, hidden_size)
    w3, b3 = lin_init(k5, k6, hidden_size, n_output)
    return {"w1": w1, "b1": b1, "w2": w2, "b2": b2, "w3": w3, "b3": b3}


def pack_qnet_params(params, n_input, n_output, hidden_size):
    """Pack the 6 tensors into one bf16 weight slab + one f32 bias slab (done once, off the
    inference critical path).  Weights/biases are zero-padded to a lane-dense PAD width."""
    pad = max(128, _round_up(max(n_input, hidden_size, n_output), 128))

    def pad_w(a):  # [r, c] -> [pad, pad]
        return jnp.pad(a, ((0, pad - a.shape[0]), (0, pad - a.shape[1])))

    def pad_b(a):  # [1, c] -> [1, pad]
        return jnp.pad(a, ((0, 0), (0, pad - a.shape[1])))

    W = jnp.stack([pad_w(params["w1"]), pad_w(params["w2"]), pad_w(params["w3"])]).astype(jnp.bfloat16)
    b = jnp.concatenate([pad_b(params["b1"]), pad_b(params["b2"]), pad_b(params["b3"])], axis=0).astype(jnp.float32)
    return {"W": W, "b": b, "pad": pad, "in_dim": n_input, "n_output": n_output}


if __name__ == "__main__":
    # Small shapes consistent with a DQN Q-network: batch=2, state_dim=8, hidden=64, actions=4.
    B, N_INPUT, N_OUTPUT, HIDDEN = 2, 8, 4, 64

    key = jax.random.PRNGKey(0)
    k_state, k_params = jax.random.split(key)

    state = jax.random.normal(k_state, (B, N_INPUT), dtype=jnp.float32)
    params = init_qnet_params(k_params, N_INPUT, N_OUTPUT, HIDDEN)
    packed = pack_qnet_params(params, N_INPUT, N_OUTPUT, HIDDEN)

    out = q_net_forward(state, packed)
    out = jax.block_until_ready(out)
    assert out.shape == (B, N_OUTPUT)

    # Pure-JAX reference with the same bf16 matmul operands / f32 accumulate as the kernel.
    # NOTE: weights/activations are bf16 on the MXU, so vs. an all-f32 PyTorch Q_Net the
    # result agrees to ~bf16 precision (acceptable for inference).
    W, bias = packed["W"], packed["b"]
    in_dim = packed["in_dim"]
    xb = state.astype(jnp.bfloat16)
    h = jnp.maximum(jnp.dot(xb, W[0, :in_dim, :], preferred_element_type=jnp.float32) + bias[0], 0.0)
    h = jnp.maximum(jnp.dot(h.astype(jnp.bfloat16), W[1], preferred_element_type=jnp.float32) + bias[1], 0.0)
    ref = (jnp.dot(h.astype(jnp.bfloat16), W[2], preferred_element_type=jnp.float32) + bias[2])[:, :N_OUTPUT]
    assert jnp.allclose(out, ref, atol=1e-3, rtol=1e-3), float(jnp.max(jnp.abs(out - ref)))

    print("KERNEL_OK")
</pallas_src>

<mosaic_0001>
module attributes {stable_mosaic.version = 11 : i64} {
  func.func @_qnet_kernel(%arg0: i32, %arg1: memref<8x8xbf16, #tpu.memory_space<vmem>>, %arg2: memref<3x128x128xbf16, #tpu.memory_space<vmem>>, %arg3: memref<3x128xf32, #tpu.memory_space<vmem>>, %arg4: memref<8x4xf32, #tpu.memory_space<vmem>>) attributes {dimension_semantics = [#tpu.dimension_semantics<parallel>], iteration_bounds = array<i64: 1>, scalar_prefetch = 0 : i64, scratch_operands = 0 : i64, tpu.core_type = #tpu.core_type<tc>, window_params = [{transform_indices = @transform_0, window_bounds = array<i64: 8, 8>}, {pipeline_mode = #tpu.pipeline_mode<synchronous>, transform_indices = @transform_1, window_bounds = array<i64: 3, 128, 128>}, {pipeline_mode = #tpu.pipeline_mode<synchronous>, transform_indices = @transform_2, window_bounds = array<i64: 3, 128>}, {transform_indices = @transform_3, window_bounds = array<i64: 8, 4>}]} {
    %c0 = arith.constant 0 : index
    %c0_0 = arith.constant 0 : index
    %0 = vector.load %arg1[%c0, %c0_0] : memref<8x8xbf16, #tpu.memory_space<vmem>>, vector<8x8xbf16>
    %c0_1 = arith.constant 0 : index
    %c0_2 = arith.constant 0 : index
    %c0_3 = arith.constant 0 : index
    %1 = vector.load %arg2[%c0_1, %c0_2, %c0_3] : memref<3x128x128xbf16, #tpu.memory_space<vmem>>, vector<1x8x128xbf16>
    %2 = vector.shape_cast %1 : vector<1x8x128xbf16> to vector<8x128xbf16>
    %cst = arith.constant dense<0.000000e+00> : vector<8x128xf32>
    %3 = tpu.matmul %0, %2, %cst {dimension_numbers = #tpu.dot_dimension_numbers<[1], [0], [0], [1], [0, 0, 1, 1], [], []>} : vector<8x8xbf16>, vector<8x128xbf16>, vector<8x128xf32> -> vector<8x128xf32>
    %c0_4 = arith.constant 0 : index
    %c0_5 = arith.constant 0 : index
    %4 = vector.load %arg3[%c0_4, %c0_5] : memref<3x128xf32, #tpu.memory_space<vmem>>, vector<1x128xf32>
    %5 = vector.broadcast %4 : vector<1x128xf32> to vector<8x128xf32>
    %6 = arith.addf %3, %5 : vector<8x128xf32>
    %cst_6 = arith.constant 0.000000e+00 : f32
    %7 = vector.broadcast %cst_6 : f32 to vector<8x128xf32>
    %8 = arith.maximumf %6, %7 : vector<8x128xf32>
    %9 = arith.truncf %8 : vector<8x128xf32> to vector<8x128xbf16>
    %c1 = arith.constant 1 : index
    %c0_7 = arith.constant 0 : index
    %c0_8 = arith.constant 0 : index
    %10 = vector.load %arg2[%c1, %c0_7, %c0_8] : memref<3x128x128xbf16, #tpu.memory_space<vmem>>, vector<1x128x128xbf16>
    %11 = vector.shape_cast %10 : vector<1x128x128xbf16> to vector<128x128xbf16>
    %cst_9 = arith.constant dense<0.000000e+00> : vector<8x128xf32>
    %12 = tpu.matmul %9, %11, %cst_9 {dimension_numbers = #tpu.dot_dimension_numbers<[1], [0], [0], [1], [0, 0, 1, 1], [], []>} : vector<8x128xbf16>, vector<128x128xbf16>, vector<8x128xf32> -> vector<8x128xf32>
    %c1_10 = arith.constant 1 : index
    %c0_11 = arith.constant 0 : index
    %13 = vector.load %arg3[%c1_10, %c0_11] : memref<3x128xf32, #tpu.memory_space<vmem>>, vector<1x128xf32>
    %14 = vector.broadcast %13 : vector<1x128xf32> to vector<8x128xf32>
    %15 = arith.addf %12, %14 : vector<8x128xf32>
    %cst_12 = arith.constant 0.000000e+00 : f32
    %16 = vector.broadcast %cst_12 : f32 to vector<8x128xf32>
    %17 = arith.maximumf %15, %16 : vector<8x128xf32>
    %18 = arith.truncf %17 : vector<8x128xf32> to vector<8x128xbf16>
    %c2 = arith.constant 2 : index
    %c0_13 = arith.constant 0 : index
    %c0_14 = arith.constant 0 : index
    %19 = vector.load %arg2[%c2, %c0_13, %c0_14] : memref<3x128x128xbf16, #tpu.memory_space<vmem>>, vector<1x128x128xbf16>
    %20 = vector.shape_cast %19 : vector<1x128x128xbf16> to vector<128x128xbf16>
    %cst_15 = arith.constant dense<0.000000e+00> : vector<8x128xf32>
    %21 = tpu.matmul %18, %20, %cst_15 {dimension_numbers = #tpu.dot_dimension_numbers<[1], [0], [0], [1], [0, 0, 1, 1], [], []>} : vector<8x128xbf16>, vector<128x128xbf16>, vector<8x128xf32> -> vector<8x128xf32>
    %c2_16 = arith.constant 2 : index
    %c0_17 = arith.constant 0 : index
    %22 = vector.load %arg3[%c2_16, %c0_17] : memref<3x128xf32, #tpu.memory_space<vmem>>, vector<1x128xf32>
    %23 = vector.broadcast %22 : vector<1x128xf32> to vector<8x128xf32>
    %24 = arith.addf %21, %23 : vector<8x128xf32>
    %25 = vector.extract_strided_slice %24 {offsets = [0, 0], sizes = [8, 4], strides = [1, 1]} : vector<8x128xf32> to vector<8x4xf32>
    %c0_18 = arith.constant 0 : index
    %c0_19 = arith.constant 0 : index
    %26 = vector.load %arg4[%c0_18, %c0_19] : memref<8x4xf32, #tpu.memory_space<vmem>>, vector<8x4xf32>
    tpu.vector_store %arg4[%c0_18, %c0_19], %25 {strides = array<i32>} : memref<8x4xf32, #tpu.memory_space<vmem>>, vector<8x4xf32>,
    return
  }
  func.func @transform_0(%arg0: i32) -> (i32, i32) {
    %c0_i32 = arith.constant 0 : i32
    %c0_i32_0 = arith.constant 0 : i32
    return %arg0, %c0_i32 : i32, i32
  }
  func.func @transform_1(%arg0: i32) -> (i32, i32, i32) {
    %c0_i32 = arith.constant 0 : i32
    %c0_i32_0 = arith.constant 0 : i32
    %c0_i32_1 = arith.constant 0 : i32
    %c0_i32_2 = arith.constant 0 : i32
    return %c0_i32, %c0_i32_0, %c0_i32_1 : i32, i32, i32
  }
  func.func @transform_2(%arg0: i32) -> (i32, i32) {
    %c0_i32 = arith.constant 0 : i32
    %c0_i32_0 = arith.constant 0 : i32
    %c0_i32_1 = arith.constant 0 : i32
    return %c0_i32, %c0_i32_0 : i32, i32
  }
  func.func @transform_3(%arg0: i32) -> (i32, i32) {
    %c0_i32 = arith.constant 0 : i32
    %c0_i32_0 = arith.constant 0 : i32
    return %arg0, %c0_i32 : i32, i32
  }
}

</mosaic_0001>

<bundles_post_ra>
// kernel: tpu_custom_call.1
= control target key start
LH: loop header
LB: loop body
LE: loop exit
PB: predicated region body
PF: predicated region fallthrough
CT: control target
= control target key end

     0   :  { %8 = vsyncpa [#allocation3], 0  ;;  %s574_s0 = inlined_call_operand.hbm [shape: bf16[8,8], index: 0, kind: input, shape index: {}]   ;;  %s575_s1 = inlined_call_operand.hbm [shape: bf16[3,128,128], index: 1, kind: input, shape index: {}]   ;;  %s576_s2 = inlined_call_operand.hbm [shape: f32[3,128], index: 2, kind: input, shape index: {}]   ;;  %s577_s3 = inlined_call_operand.vmem [shape: f32[8,4], index: 3, kind: output, shape index: {}]  }
   0x1   :  { %9 = vsyncpa [#allocation5], 0  ;;  %s512_s12 = smov [#allocation4]  }
   0x2   :  { %s25_s13 = sshll.u32 %s512_s12, 4  ;;  %s26_s13 = int_to_ptr.vmem [resolvable:$true] %s25_s13 }
   0x3   :  { %s456_s14 = scalar_lea.vmem %s26_s13, 3072  ;;  %p461_p1 = scmp.lt.s32.totalorder %s26_s13, %s26_s13 }
   0x4   :  { %p457_p0 = scmp.ne.s32.totalorder %s26_s13, %s456_s14  ;;  %p462_p2 = scmp.lt.s32.totalorder %s456_s14, %s456_s14 }
   0x6   :  { %p463_p3 = por %p462_p2, %p461_p1 }
   0x8   :  { %p464_p4 = pnand %p463_p3, %p457_p0 }
   0xa   :  { %467 = shalt.err (!%p464_p4)
}
   0xb   :  { %s513_s15 = smov 64   ;;  %s514_s16 = smov 4  }
   0xc   :  { %31 = dma.hbm_to_vmem [thread:$0]  %s575_s1, 3072, %s26_s13, [#allocation5], %s513_s15, %s513_s15, %s514_s16  }
   0xd   :  { %s515_s19 = smov [#allocation2]   ;;  %s516_s21 = smov [#allocation6]  }
   0xe   :  { %s16_s20 = sshll.u32 %s515_s19, 4  ;;  %s38_s22 = sshll.u32 %s516_s21, 4  ;;  %s17_s20 = int_to_ptr.vmem [resolvable:$true] %s16_s20  ;;  %s39_s22 = int_to_ptr.vmem [resolvable:$true] %s38_s22 }
   0xf   :  { %s476_s23 = scalar_lea.vmem %s17_s20, 64  ;;  %p481_p6 = scmp.lt.s32.totalorder %s17_s20, %s17_s20 }
  0x10   :  { %p477_p5 = scmp.ne.s32.totalorder %s17_s20, %s476_s23  ;;  %p482_p7 = scmp.lt.s32.totalorder %s476_s23, %s476_s23 }
  0x12   :  { %p483_p8 = por %p482_p7, %p481_p6 }
  0x14   :  { %p484_p9 = pnand %p483_p8, %p477_p5 }
  0x16   :  { %487 = shalt.err (!%p484_p9)
}
  0x17   :  { %19 = dma.hbm_to_vmem [thread:$0]  %s574_s0, 64, %s17_s20, [#allocation3]  }
  0x18   :  { %s496_s26 = scalar_lea.vmem %s39_s22, 64  ;;  %p501_p11 = scmp.lt.s32.totalorder %s39_s22, %s39_s22 }
  0x19   :  { %p497_p10 = scmp.ne.s32.totalorder %s39_s22, %s496_s26  ;;  %p502_p12 = scmp.lt.s32.totalorder %s496_s26, %s496_s26 }
  0x1b   :  { %p503_p13 = por %p502_p12, %p501_p11 }
  0x1d   :  { %p504_p0 = pnand %p503_p13, %p497_p10 }
  0x1f   :  { %507 = shalt.err (!%p504_p0)
}
  0x20   :  { %41 = dma.hbm_to_vmem [thread:$0]  %s576_s2, 64, %s39_s22, [#allocation5]  }
  0x21   :  { %508 = dma.done.wait [#allocation3], 64  }
  0x22   :  { %509 = vsyncadd [#allocation3], 4294967232 }
  0x23   :  { %510 = dma.done.wait [#allocation5], 3136  }
  0x24   :  { %511 = vsyncadd [#allocation5], 4294964160  ;;  %v517_v0 = vmov 0.0   ;;  %vm518_vm0 = vmmov 0   ;;  %vm63_vm1 = vcmask 1043456   ;;  %vm59_vm2 = vcmask 64512  }
  0x25   :  { %379 = vmatprep.subr.bf16.mxu0 %v517_v0  ;;  %381 = vmatprep.mubr.msk.bf16.mxu0 %vm518_vm0, %v517_v0  ;;  %v53_v1 = vld [vmem:[#allocation4] sm:$0xf]  ;;  %v432_v3 = vld [vmem:[#allocation4 + $0x78] sm:$0xff]   ;;  %v433_v5 = vld [vmem:[#allocation4 + $0x70] sm:$0xff]   ;;  %vm331_vm3 = vcmask 31744  }
  0x26   :  { %385 = vmatprep.subr.bf16.mxu1 %v517_v0  ;;  %401 = vmatprep.mubr.msk.bf16.mxu1 %vm518_vm0, %v517_v0  ;;  %v65_v2 = vsel %vm63_vm1, %v53_v1, 0  ;;  %v52_v4 = vld [vmem:[#allocation2] sm:$0xf]  ;;  %v434_v6 = vld [vmem:[#allocation4 + $0x68] sm:$0xff]   ;;  %v435_v7 = vld [vmem:[#allocation4 + $0x60] sm:$0xff]  }
  0x27   :  { %380 = vmatpush3.bf16.msra.mxu0 %v65_v2  ;;  %386 = vmatpush3.bf16.msra.mxu1 %v432_v3  ;;  %v436_v8 = vld [vmem:[#allocation4 + $0x58] sm:$0xff]   ;;  %v437_v9 = vld [vmem:[#allocation4 + $0x50] sm:$0xff]   ;;  %v438_v10 = vld [vmem:[#allocation4 + $0x48] sm:$0xff]  }
  0x28   :  { %405 = vmatprep.subr.bf16.mxu0 %v517_v0  ;;  %387 = vmatprep.subr.bf16.mxu1 %v517_v0  ;;  %v439_v11 = vld [vmem:[#allocation4 + $0x40] sm:$0xff]   ;;  %v440_v12 = vld [vmem:[#allocation4 + $0xb8] sm:$0xff]   ;;  %v441_v13 = vld [vmem:[#allocation4 + $0xb0] sm:$0xff]  }
  0x29   :  { %v442_v14 = vld [vmem:[#allocation4 + $0xa8] sm:$0xff]   ;;  %v443_v15 = vld [vmem:[#allocation4 + $0xa0] sm:$0xff]   ;;  %v444_v16 = vld [vmem:[#allocation4 + $0x98] sm:$0xff]  }
  0x2a   :  { %382 = vmatmul.mubr.msk.bf16.vlgmr.msra.gmra.mxu0 %vm59_vm2, %v52_v4  ;;  %v445_v17 = vld [vmem:[#allocation4 + $0x90] sm:$0xff]   ;;  %v339_v18 = vld [vmem:[#allocation6] ss:$0 sm:$0xff]  ;;  %v446_v26 = vld [vmem:[#allocation4 + $0x88] sm:$0xff]  }
  0x2b   :  { %421 = vmatprep.mubr.msk.bf16.mxu0 %vm518_vm0, %v517_v0  ;;  %388 = vmatpush3.bf16.msra.mxu1 %v433_v5  ;;  %v447_v27 = vld [vmem:[#allocation4 + $0x80] sm:$0xff]  }
  0x2c   :  { %389 = vmatprep.subr.bf16.mxu1 %v517_v0  ;;  %406 = vmatpush3.bf16.msra.mxu0 %v440_v12  ;;  %v341_v28 = vld [vmem:[#allocation6 + $0x1] ss:$0 sm:$0xff]  ;;  %v350_v36 = vld [vmem:[#allocation6 + $0x2] ss:$0 sm:$0xff] }
  0x2d   :  { %407 = vmatprep.subr.bf16.mxu0 %v517_v0 }
  0x2f   :  { %390 = vmatpush3.bf16.msra.mxu1 %v434_v6 }
  0x30   :  { %391 = vmatprep.subr.bf16.mxu1 %v517_v0  ;;  %408 = vmatpush3.bf16.msra.mxu0 %v441_v13 }
  0x31   :  { %409 = vmatprep.subr.bf16.mxu0 %v517_v0 }
  0x33   :  { %392 = vmatpush3.bf16.msra.mxu1 %v435_v7 }
  0x34   :  { %393 = vmatprep.subr.bf16.mxu1 %v517_v0  ;;  %410 = vmatpush3.bf16.msra.mxu0 %v442_v14 }
  0x35   :  { %411 = vmatprep.subr.bf16.mxu0 %v517_v0 }
  0x37   :  { %394 = vmatpush3.bf16.msra.mxu1 %v436_v8 }
  0x38   :  { %395 = vmatprep.subr.bf16.mxu1 %v517_v0  ;;  %412 = vmatpush3.bf16.msra.mxu0 %v443_v15 }
  0x39   :  { %413 = vmatprep.subr.bf16.mxu0 %v517_v0 }
  0x3b   :  { %396 = vmatpush3.bf16.msra.mxu1 %v437_v9 }
  0x3c   :  { %397 = vmatprep.subr.bf16.mxu1 %v517_v0  ;;  %414 = vmatpush3.bf16.msra.mxu0 %v444_v16 }
  0x3d   :  { %415 = vmatprep.subr.bf16.mxu0 %v517_v0 }
  0x3f   :  { %398 = vmatpush3.bf16.msra.mxu1 %v438_v10 }
  0x40   :  { %399 = vmatprep.subr.bf16.mxu1 %v517_v0  ;;  %416 = vmatpush3.bf16.msra.mxu0 %v445_v17 }
  0x41   :  { %417 = vmatprep.subr.bf16.mxu0 %v517_v0 }
  0x43   :  { %400 = vmatpush3.bf16.msra.mxu1 %v439_v11 }
  0x44   :  { %418 = vmatpush3.bf16.msra.mxu0 %v446_v26 }
  0x45   :  { %419 = vmatprep.subr.bf16.mxu0 %v517_v0 }
  0x48   :  { %420 = vmatpush3.bf16.msra.mxu0 %v447_v27 }
  0xea   :  { %v101_v19 = vpop.f32.mrf.mxu0 }
  0xeb   :  { %v102_v20 = vadd.f32 %v339_v18, %v101_v19 }
  0xec   :  { %v383_v21 = vpop.f32.mrf.mxu0 }
  0xed   :  { %v107_v22 = vmax.f32 %v102_v20, 0.0 }
  0xee   :  { %v104_v23 = vpop.f32.mrf.mxu0 }
  0xef   :  { %v108_v24 = vpack.c.bf16 %v107_v22, %v107_v22 }
  0xf0   :  { %v384_v25 = vpop.f32.mrf.mxu0 }
  0xf1   :  { %402 = vmatmul.mubr.bf16.vlgmr.msra.gmra.mxu1 %v108_v24 }
 0x1b1   :  { %v213_v29 = vpop.f32.mrf.mxu1 }
 0x1b2   :  { %v214_v30 = vadd.f32 %v341_v28, %v213_v29 }
 0x1b3   :  { %v403_v31 = vpop.f32.mrf.mxu1 }
 0x1b4   :  { %v219_v32 = vmax.f32 %v214_v30, 0.0 }
 0x1b5   :  { %v216_v33 = vpop.f32.mrf.mxu1 }
 0x1b6   :  { %v220_v34 = vpack.c.bf16 %v219_v32, %v219_v32 }
 0x1b7   :  { %v404_v35 = vpop.f32.mrf.mxu1 }
 0x1b8   :  { %422 = vmatmul.mubr.bf16.vlgmr.msra.gmra.mxu0 %v220_v34 }
 0x278   :  { %v325_v37 = vpop.f32.mrf.mxu0 }
 0x279   :  { %v326_v38 = vadd.f32 %v350_v36, %v325_v37 }
 0x27a   :  { %v423_v39 = vpop.f32.mrf.mxu0 }
 0x27b   :  { %332 = vst.msk [vmem:[%s577_s3] sm:$0xff] %vm331_vm3, %v326_v38 }
 0x27c   :  { %v328_v40 = vpop.f32.mrf.mxu0 }
 0x27e   :  { %v424_v41 = vpop.f32.mrf.mxu0 }
 0x27f   :  { %337 = vsyncpa [#allocation3], 1 }
 0x280   :  { %338 = vsyncpa [#allocation5], 1 }

</bundles_post_ra>
